<compile_context>
chip_gen: v7x
topology: tpu7x:2x2x1
jax: 0.10.0
libtpu: 0.0.40
codegen_flags: <defaults>
</compile_context>

<pallas_src>
import random

import numpy as np
import jax
import jax.numpy as jnp
from jax.experimental import pallas as pl
from jax.experimental.pallas import tpu as pltpu

LANE = 128
SUBLANE = 8
MAX_BATCH_TILE = 256


def _round_up(n, m):
    return ((n + m - 1) // m) * m


# ----------------------------- Pallas kernel ------------------------------ #
def _flex_tree_kernel(x_ref, wx_ref, wh_ref, bias_ref, o_ref):
    """Fused whole-tree forward for one batch tile.

    x_ref   : (TB, F)                 raw features (f32)
    wx_ref  : (L, F, NPAD)            per-level folded leaf-feature weights (w/b)
    wh_ref  : (max(L-1,1), NH, NPAD)  per-level folded child-neuron weights (w/b)
    bias_ref: (L, NPAD)               -a/b on real neuron columns, 0 elsewhere
    o_ref   : (TB, NPAD)              lane-dense output slab; root output in col 0
    """
    n_levels = wx_ref.shape[0]
    nh = wh_ref.shape[1]

    x = x_ref[...]
    bias = bias_ref[...]                      # tiny, load once

    # Deepest level: all children are leaf feature columns.
    z = jnp.dot(x, wx_ref[0], preferred_element_type=jnp.float32) + bias[0:1, :]
    h = jnp.exp(-(z * z))

    # Walk up the tree; intermediates stay in vregs, never touch HBM.
    # NOTE: padded h columns equal exp(0)=1 — harmless only because the
    # corresponding wh rows are zero and we only contract the first nh columns.
    for s in range(1, n_levels):              # n_levels <= max_depth, static unroll
        z = (jnp.dot(x, wx_ref[s], preferred_element_type=jnp.float32)
             + jnp.dot(h[:, :nh], wh_ref[s - 1],
                       preferred_element_type=jnp.float32)
             + bias[s:s + 1, :])
        h = jnp.exp(-(z * z))

    o_ref[...] = h


def _pallas_forward(x, wx, wh, bias, tb):
    B, F = x.shape
    L, _, NPAD = wx.shape
    LH, NH, _ = wh.shape
    grid = (B // tb,)
    return pl.pallas_call(
        _flex_tree_kernel,
        out_shape=jax.ShapeDtypeStruct((B, NPAD), jnp.float32),
        grid=grid,
        in_specs=[
            pl.BlockSpec((tb, F), lambda i: (i, 0)),
            pl.BlockSpec((L, F, NPAD), lambda i: (0, 0, 0)),    # VMEM-resident
            pl.BlockSpec((LH, NH, NPAD), lambda i: (0, 0, 0)),  # VMEM-resident
            pl.BlockSpec((L, NPAD), lambda i: (0, 0)),          # VMEM-resident
        ],
        out_specs=pl.BlockSpec((tb, NPAD), lambda i: (i, 0)),
        compiler_params=pltpu.CompilerParams(
            dimension_semantics=("parallel",)),
    )(x, wx, wh, bias)


@jax.jit
def flex_tree_forward(X, wx, wh, bias):
    """X: (B, F) f32, packed tree weights -> (B, 1) f32 (root neuron output)."""
    B, _ = X.shape
    tb = min(_round_up(B, SUBLANE), MAX_BATCH_TILE)   # batch tile
    B_pad = _round_up(B, tb)
    x = X.astype(jnp.float32)
    if B_pad != B:                    # not hit when B is already a multiple of 8
        x = jnp.pad(x, ((0, B_pad - B), (0, 0)))
    out = _pallas_forward(x, wx, wh, bias, tb)
    return out[:B, :1]


# --------------------------- Tree construction ----------------------------- #
class Leaf:
    def __init__(self, n_features):
        self.idx = random.randint(0, n_features - 1)


class Neuron:
    def __init__(self, n_features, n_child, neuron_ratio, depth, key):
        self.n_child = n_child
        key, wkey = jax.random.split(key)
        # torch.nn.init.xavier_normal_ on a (n_child, 1) tensor:
        # fan_in = 1, fan_out = n_child  ->  std = sqrt(2 / (n_child + 1))
        std = (2.0 / (n_child + 1)) ** 0.5
        self.w = (std * jax.random.normal(wkey, (n_child, 1))).astype(jnp.float32)
        self.children = []
        for _ in range(n_child):
            key, ckey = jax.random.split(key)
            if random.random() < neuron_ratio and depth > 1:
                self.children.append(
                    Neuron(
                        n_features,
                        random.randint(2, max(n_child + 2, 3)),
                        neuron_ratio,
                        depth - 1,
                        ckey,
                    )
                )
            else:
                self.children.append(Leaf(n_features))


def _collect_levels(root):
    """BFS levels: levels[0] = [root], children neurons are one level deeper."""
    levels = []
    frontier = [root]
    while frontier:
        levels.append(frontier)
        nxt = []
        for neuron in frontier:
            for ch in neuron.children:
                if isinstance(ch, Neuron):
                    nxt.append(ch)
        frontier = nxt
    return levels


def pack_tree(root, n_features, a, b):
    """Fold topology + weights + (a, b) into dense per-level slabs.

    Step s=0 is the DEEPEST level, s=L-1 is the root.
      wx  : (L, F, NPAD)            leaf-feature contributions (w/b)
      wh  : (max(L-1,1), NH, NPAD)  previous-level-neuron contributions (w/b)
      bias: (L, NPAD)               -a/b on real neuron columns, 0 on padding
    """
    levels = _collect_levels(root)
    L = len(levels)
    widths = [len(lv) for lv in levels]
    NPAD = _round_up(max(max(widths), 1), LANE)           # lane-dense output slab
    NH = _round_up(max(widths[1:], default=1), SUBLANE)   # widest non-root level

    wx = np.zeros((L, n_features, NPAD), np.float32)
    wh = np.zeros((max(L - 1, 1), NH, NPAD), np.float32)
    bias = np.zeros((L, NPAD), np.float32)
    inv_b = 1.0 / float(b)
    bias_val = -float(a) * inv_b

    for s in range(L):
        li = L - 1 - s                                    # tree level at step s
        child_pos = (
            {id(n): k for k, n in enumerate(levels[li + 1])} if li + 1 < L else {}
        )
        for j, neuron in enumerate(levels[li]):
            w = np.asarray(neuron.w, dtype=np.float32).reshape(-1)
            for c, ch in enumerate(neuron.children):
                if isinstance(ch, Leaf):
                    wx[s, ch.idx, j] += w[c] * inv_b
                else:
                    wh[s - 1, child_pos[id(ch)], j] += w[c] * inv_b
            bias[s, j] = bias_val
    return jnp.asarray(wx), jnp.asarray(wh), jnp.asarray(bias)


# --------------------------- Pure-JAX reference ----------------------------- #
def forward_ref(neuron, X, a, b):
    """Matches the PyTorch FlexNeuron.forward semantics exactly."""
    cols = []
    for child in neuron.children:
        if isinstance(child, Leaf):
            cols.append(X[:, child.idx])
        else:
            cols.append(forward_ref(child, X, a, b).reshape(-1))
    mat = jnp.stack(cols, axis=1).astype(jnp.float32)
    z = (mat @ neuron.w - a) / b
    return jnp.exp(-(z ** 2))


# ---------------------------------- Main ----------------------------------- #
if __name__ == "__main__":
    # Deterministic tree topology + weights.
    random.seed(0)
    key = jax.random.PRNGKey(0)

    B, F = 8, 16                        # batch, n_features
    max_depth, neuron_ratio = 3, 0.3

    key, xkey, tkey = jax.random.split(key, 3)
    X = jax.random.normal(xkey, (B, F), dtype=jnp.float32)

    # FlexTree.__init__: n_0 = random.randint(4, max(x_len // 3, 6))
    n_0 = random.randint(4, max(F // 3, 6))
    root = Neuron(F, n_0, neuron_ratio, max_depth, tkey)

    # Shared parameters a=0.2, b=0.5 (as in FlexTree.__init__), folded on host.
    a, b = 0.2, 0.5
    wx, wh, bias = pack_tree(root, F, a, b)

    y = flex_tree_forward(X, wx, wh, bias)
    y = jax.block_until_ready(y)

    y_ref = forward_ref(root, X, a, b)
    assert y.shape == (B, 1), y.shape
    assert y.dtype == jnp.float32
    assert jnp.allclose(y, y_ref, atol=1e-5, rtol=1e-5), (y, y_ref)

    # TODO(synk): training (Adam/BCELoss) and GP mutation/crossover are
    # host-side tree edits; re-run pack_tree after any topology change.
    print("KERNEL_OK")
</pallas_src>

<mosaic_0001>
module attributes {stable_mosaic.version = 11 : i64} {
  func.func @_flex_tree_kernel(%arg0: i32, %arg1: memref<8x16xf32, #tpu.memory_space<vmem>>, %arg2: memref<3x16x128xf32, #tpu.memory_space<vmem>>, %arg3: memref<2x8x128xf32, #tpu.memory_space<vmem>>, %arg4: memref<3x128xf32, #tpu.memory_space<vmem>>, %arg5: memref<8x128xf32, #tpu.memory_space<vmem>>) attributes {dimension_semantics = [#tpu.dimension_semantics<parallel>], iteration_bounds = array<i64: 1>, scalar_prefetch = 0 : i64, scratch_operands = 0 : i64, tpu.core_type = #tpu.core_type<tc>, window_params = [{transform_indices = @transform_0, window_bounds = array<i64: 8, 16>}, {pipeline_mode = #tpu.pipeline_mode<synchronous>, transform_indices = @transform_1, window_bounds = array<i64: 3, 16, 128>}, {pipeline_mode = #tpu.pipeline_mode<synchronous>, transform_indices = @transform_2, window_bounds = array<i64: 2, 8, 128>}, {pipeline_mode = #tpu.pipeline_mode<synchronous>, transform_indices = @transform_3, window_bounds = array<i64: 3, 128>}, {transform_indices = @transform_4, window_bounds = array<i64: 8, 128>}]} {
    %c0 = arith.constant 0 : index
    %c0_0 = arith.constant 0 : index
    %0 = vector.load %arg1[%c0, %c0_0] : memref<8x16xf32, #tpu.memory_space<vmem>>, vector<8x16xf32>
    %c0_1 = arith.constant 0 : index
    %c0_2 = arith.constant 0 : index
    %1 = vector.load %arg4[%c0_1, %c0_2] : memref<3x128xf32, #tpu.memory_space<vmem>>, vector<3x128xf32>
    %c0_3 = arith.constant 0 : index
    %c0_4 = arith.constant 0 : index
    %c0_5 = arith.constant 0 : index
    %2 = vector.load %arg2[%c0_3, %c0_4, %c0_5] : memref<3x16x128xf32, #tpu.memory_space<vmem>>, vector<1x16x128xf32>
    %3 = vector.shape_cast %2 : vector<1x16x128xf32> to vector<16x128xf32>
    %cst = arith.constant dense<0.000000e+00> : vector<8x128xf32>
    %4 = tpu.matmul %0, %3, %cst {dimension_numbers = #tpu.dot_dimension_numbers<[1], [0], [0], [1], [0, 0, 1, 1], [], []>} : vector<8x16xf32>, vector<16x128xf32>, vector<8x128xf32> -> vector<8x128xf32>
    %5 = vector.extract_strided_slice %1 {offsets = [0, 0], sizes = [1, 128], strides = [1, 1]} : vector<3x128xf32> to vector<1x128xf32>
    %6 = vector.broadcast %5 : vector<1x128xf32> to vector<8x128xf32>
    %7 = arith.addf %4, %6 : vector<8x128xf32>
    %8 = arith.mulf %7, %7 : vector<8x128xf32>
    %cst_6 = arith.constant 0.000000e+00 : f32
    %9 = vector.broadcast %cst_6 : f32 to vector<8x128xf32>
    %10 = arith.subf %9, %8 : vector<8x128xf32>
    %11 = math.exp %10 : vector<8x128xf32>
    %c1 = arith.constant 1 : index
    %c0_7 = arith.constant 0 : index
    %c0_8 = arith.constant 0 : index
    %12 = vector.load %arg2[%c1, %c0_7, %c0_8] : memref<3x16x128xf32, #tpu.memory_space<vmem>>, vector<1x16x128xf32>
    %13 = vector.shape_cast %12 : vector<1x16x128xf32> to vector<16x128xf32>
    %cst_9 = arith.constant dense<0.000000e+00> : vector<8x128xf32>
    %14 = tpu.matmul %0, %13, %cst_9 {dimension_numbers = #tpu.dot_dimension_numbers<[1], [0], [0], [1], [0, 0, 1, 1], [], []>} : vector<8x16xf32>, vector<16x128xf32>, vector<8x128xf32> -> vector<8x128xf32>
    %15 = vector.extract_strided_slice %11 {offsets = [0, 0], sizes = [8, 8], strides = [1, 1]} : vector<8x128xf32> to vector<8x8xf32>
    %c0_10 = arith.constant 0 : index
    %c0_11 = arith.constant 0 : index
    %c0_12 = arith.constant 0 : index
    %16 = vector.load %arg3[%c0_10, %c0_11, %c0_12] : memref<2x8x128xf32, #tpu.memory_space<vmem>>, vector<1x8x128xf32>
    %17 = vector.shape_cast %16 : vector<1x8x128xf32> to vector<8x128xf32>
    %cst_13 = arith.constant dense<0.000000e+00> : vector<8x128xf32>
    %18 = tpu.matmul %15, %17, %cst_13 {dimension_numbers = #tpu.dot_dimension_numbers<[1], [0], [0], [1], [0, 0, 1, 1], [], []>} : vector<8x8xf32>, vector<8x128xf32>, vector<8x128xf32> -> vector<8x128xf32>
    %19 = arith.addf %14, %18 : vector<8x128xf32>
    %20 = vector.extract_strided_slice %1 {offsets = [1, 0], sizes = [1, 128], strides = [1, 1]} : vector<3x128xf32> to vector<1x128xf32>
    %21 = vector.broadcast %20 : vector<1x128xf32> to vector<8x128xf32>
    %22 = arith.addf %19, %21 : vector<8x128xf32>
    %23 = arith.mulf %22, %22 : vector<8x128xf32>
    %cst_14 = arith.constant 0.000000e+00 : f32
    %24 = vector.broadcast %cst_14 : f32 to vector<8x128xf32>
    %25 = arith.subf %24, %23 : vector<8x128xf32>
    %26 = math.exp %25 : vector<8x128xf32>
    %c2 = arith.constant 2 : index
    %c0_15 = arith.constant 0 : index
    %c0_16 = arith.constant 0 : index
    %27 = vector.load %arg2[%c2, %c0_15, %c0_16] : memref<3x16x128xf32, #tpu.memory_space<vmem>>, vector<1x16x128xf32>
    %28 = vector.shape_cast %27 : vector<1x16x128xf32> to vector<16x128xf32>
    %cst_17 = arith.constant dense<0.000000e+00> : vector<8x128xf32>
    %29 = tpu.matmul %0, %28, %cst_17 {dimension_numbers = #tpu.dot_dimension_numbers<[1], [0], [0], [1], [0, 0, 1, 1], [], []>} : vector<8x16xf32>, vector<16x128xf32>, vector<8x128xf32> -> vector<8x128xf32>
    %30 = vector.extract_strided_slice %26 {offsets = [0, 0], sizes = [8, 8], strides = [1, 1]} : vector<8x128xf32> to vector<8x8xf32>
    %c1_18 = arith.constant 1 : index
    %c0_19 = arith.constant 0 : index
    %c0_20 = arith.constant 0 : index
    %31 = vector.load %arg3[%c1_18, %c0_19, %c0_20] : memref<2x8x128xf32, #tpu.memory_space<vmem>>, vector<1x8x128xf32>
    %32 = vector.shape_cast %31 : vector<1x8x128xf32> to vector<8x128xf32>
    %cst_21 = arith.constant dense<0.000000e+00> : vector<8x128xf32>
    %33 = tpu.matmul %30, %32, %cst_21 {dimension_numbers = #tpu.dot_dimension_numbers<[1], [0], [0], [1], [0, 0, 1, 1], [], []>} : vector<8x8xf32>, vector<8x128xf32>, vector<8x128xf32> -> vector<8x128xf32>
    %34 = arith.addf %29, %33 : vector<8x128xf32>
    %35 = vector.extract_strided_slice %1 {offsets = [2, 0], sizes = [1, 128], strides = [1, 1]} : vector<3x128xf32> to vector<1x128xf32>
    %36 = vector.broadcast %35 : vector<1x128xf32> to vector<8x128xf32>
    %37 = arith.addf %34, %36 : vector<8x128xf32>
    %38 = arith.mulf %37, %37 : vector<8x128xf32>
    %cst_22 = arith.constant 0.000000e+00 : f32
    %39 = vector.broadcast %cst_22 : f32 to vector<8x128xf32>
    %40 = arith.subf %39, %38 : vector<8x128xf32>
    %41 = math.exp %40 : vector<8x128xf32>
    %c0_23 = arith.constant 0 : index
    %c0_24 = arith.constant 0 : index
    %42 = vector.load %arg5[%c0_23, %c0_24] : memref<8x128xf32, #tpu.memory_space<vmem>>, vector<8x128xf32>
    tpu.vector_store %arg5[%c0_23, %c0_24], %41 {strides = array<i32>} : memref<8x128xf32, #tpu.memory_space<vmem>>, vector<8x128xf32>,
    return
  }
  func.func @transform_0(%arg0: i32) -> (i32, i32) {
    %c0_i32 = arith.constant 0 : i32
    %c0_i32_0 = arith.constant 0 : i32
    return %arg0, %c0_i32 : i32, i32
  }
  func.func @transform_1(%arg0: i32) -> (i32, i32, i32) {
    %c0_i32 = arith.constant 0 : i32
    %c0_i32_0 = arith.constant 0 : i32
    %c0_i32_1 = arith.constant 0 : i32
    %c0_i32_2 = arith.constant 0 : i32
    return %c0_i32, %c0_i32_0, %c0_i32_1 : i32, i32, i32
  }
  func.func @transform_2(%arg0: i32) -> (i32, i32, i32) {
    %c0_i32 = arith.constant 0 : i32
    %c0_i32_0 = arith.constant 0 : i32
    %c0_i32_1 = arith.constant 0 : i32
    %c0_i32_2 = arith.constant 0 : i32
    return %c0_i32, %c0_i32_0, %c0_i32_1 : i32, i32, i32
  }
  func.func @transform_3(%arg0: i32) -> (i32, i32) {
    %c0_i32 = arith.constant 0 : i32
    %c0_i32_0 = arith.constant 0 : i32
    %c0_i32_1 = arith.constant 0 : i32
    return %c0_i32, %c0_i32_0 : i32, i32
  }
  func.func @transform_4(%arg0: i32) -> (i32, i32) {
    %c0_i32 = arith.constant 0 : i32
    %c0_i32_0 = arith.constant 0 : i32
    return %arg0, %c0_i32 : i32, i32
  }
}

</mosaic_0001>

<bundles_post_ra>
// kernel: flex_tree_forward.1
= control target key start
LH: loop header
LB: loop body
LE: loop exit
PB: predicated region body
PF: predicated region fallthrough
CT: control target
= control target key end

     0   :  { %9 = vsyncpa [#allocation3], 0  ;;  %s696_s0 = inlined_call_operand.hbm [shape: f32[8,16], index: 0, kind: input, shape index: {}]   ;;  %s697_s1 = inlined_call_operand.hbm [shape: f32[3,16,128], index: 1, kind: input, shape index: {}]   ;;  %s698_s2 = inlined_call_operand.hbm [shape: f32[2,8,128], index: 2, kind: input, shape index: {}]   ;;  %s699_s3 = inlined_call_operand.vmem [shape: f32[3,128], index: 3, kind: input, shape index: {}]   ;;  %s700_s4 = inlined_call_operand.vmem [shape: f32[8,128], index: 4, kind: output, shape index: {}]  }
   0x1   :  { %10 = vsyncpa [#allocation5], 0  ;;  %s605_s15 = smov [#allocation4]   ;;  %s535_s19 = scalar_lea.hbm %s697_s1, 768 }
   0x2   :  { %s26_s16 = sshll.u32 %s605_s15, 4  ;;  %p536_p0 = scmp.ne.s32.totalorder %s697_s1, %s535_s19  ;;  %s27_s16 = int_to_ptr.vmem [resolvable:$true] %s26_s16 }
   0x3   :  { %p539_p1 = scmp.lt.u32.totalorder %s535_s19, %s697_s1 }
   0x5   :  { %p541_p2 = pnand %p539_p1, %p536_p0 }
   0x7   :  { %544 = shalt.err (!%p541_p2)
}
   0x8   :  { %s545_s24 = scalar_lea.vmem %s27_s16, 768  ;;  %p550_p4 = scmp.lt.s32.totalorder %s27_s16, %s27_s16 }
   0x9   :  { %p546_p3 = scmp.ne.s32.totalorder %s27_s16, %s545_s24  ;;  %p551_p5 = scmp.lt.s32.totalorder %s545_s24, %s545_s24 }
   0xb   :  { %p552_p6 = por %p551_p5, %p550_p4 }
   0xd   :  { %p553_p7 = pnand %p552_p6, %p546_p3 }
   0xf   :  { %556 = shalt.err (!%p553_p7)
}
  0x10   :  { %s606_s25 = smov 128   ;;  %s607_s26 = smov 8  }
  0x11   :  { %32 = dma.hbm_to_vmem [thread:$0]  %s697_s1, 768, %s27_s16, [#allocation5], %s606_s25, %s606_s25, %s607_s26  }
  0x12   :  { %s608_s29 = smov [#allocation2]   ;;  %s609_s5 = smov [#allocation6]  }
  0x13   :  { %s17_s30 = sshll.u32 %s608_s29, 4  ;;  %s38_s6 = sshll.u32 %s609_s5, 4  ;;  %s18_s30 = int_to_ptr.vmem [resolvable:$true] %s17_s30  ;;  %s39_s6 = int_to_ptr.vmem [resolvable:$true] %s38_s6 }
  0x14   :  { %s557_s9 = scalar_lea.hbm %s696_s0, 128 }
  0x15   :  { %p558_p8 = scmp.ne.s32.totalorder %s696_s0, %s557_s9  ;;  %p561_p9 = scmp.lt.u32.totalorder %s557_s9, %s696_s0 }
  0x17   :  { %p563_p10 = pnand %p561_p9, %p558_p8 }
  0x19   :  { %566 = shalt.err (!%p563_p10)
}
  0x1a   :  { %s567_s1 = scalar_lea.vmem %s18_s30, 128  ;;  %p572_p12 = scmp.lt.s32.totalorder %s18_s30, %s18_s30 }
  0x1b   :  { %p568_p11 = scmp.ne.s32.totalorder %s18_s30, %s567_s1  ;;  %p573_p13 = scmp.lt.s32.totalorder %s567_s1, %s567_s1 }
  0x1d   :  { %p574_p0 = por %p573_p13, %p572_p12 }
  0x1f   :  { %p575_p1 = pnand %p574_p0, %p568_p11 }
  0x21   :  { %578 = shalt.err (!%p575_p1)
}
  0x22   :  { %20 = dma.hbm_to_vmem [thread:$0]  %s696_s0, 128, %s18_s30, [#allocation3]  }
  0x23   :  { %s579_s18 = scalar_lea.hbm %s698_s2, 256 }
  0x24   :  { %p580_p2 = scmp.ne.s32.totalorder %s698_s2, %s579_s18  ;;  %p583_p3 = scmp.lt.u32.totalorder %s579_s18, %s698_s2 }
  0x26   :  { %p585_p4 = pnand %p583_p3, %p580_p2 }
  0x28   :  { %588 = shalt.err (!%p585_p4)
}
  0x29   :  { %s589_s23 = scalar_lea.vmem %s39_s6, 256  ;;  %p594_p6 = scmp.lt.s32.totalorder %s39_s6, %s39_s6 }
  0x2a   :  { %p590_p5 = scmp.ne.s32.totalorder %s39_s6, %s589_s23  ;;  %p595_p7 = scmp.lt.s32.totalorder %s589_s23, %s589_s23 }
  0x2c   :  { %p596_p8 = por %p595_p7, %p594_p6 }
  0x2e   :  { %p597_p9 = pnand %p596_p8, %p590_p5 }
  0x30   :  { %600 = shalt.err (!%p597_p9)
}
  0x31   :  { %44 = dma.hbm_to_vmem [thread:$0]  %s698_s2, 256, %s39_s6, [#allocation5], %s606_s25, %s606_s25, %s607_s26  }
  0x32   :  { %601 = dma.done.wait [#allocation3], 128  }
  0x33   :  { %602 = vsyncadd [#allocation3], 4294967168 }
  0x34   :  { %603 = dma.done.wait [#allocation5], 1024  }
  0x35   :  { %604 = vsyncadd [#allocation5], 4294966272  ;;  %v610_v0 = vmov 0.0|0.0   ;;  %vm611_vm0 = vmmov 0   ;;  %v612_v1 = vmov 0.0   ;;  %v58_v2 = vld [vmem:[#allocation4] sm:$0xff]  ;;  %v60_v7 = vlaneseq }
  0x36   :  { %512 = vmatprep.subr.bf16.mxu0 %v610_v0  ;;  %485 = vmatprep.mubr.msk.f32.mxu0 %vm611_vm0, %v612_v1  ;;  %v59_v3 = vld [vmem:[#allocation4 + $0x8] sm:$0xff]  ;;  %v56_v5 = vld [vmem:[#allocation2] sm:$0xff]  ;;  %vm64_vm1 = vcmask 130048   ;;  %v145_v6 = vld [vmem:[#allocation6] sm:$0xff]  ;;  %vm146_vm2 = vcmask 64512  }
  0x37   :  { %488 = vmatprep.subr.mxu1 %v612_v1  ;;  %490 = vmatprep.mubr.msk.f32.mxu1 %vm611_vm0, %v612_v1  ;;  %v513_v4 = vpack.c.bf16 %v59_v3, %v58_v2  ;;  %v61_v8 = vshrl.u32 %v60_v7, 7  ;;  %v57_v10 = vld [vmem:[%s699_s3] sm:$0x7]  ;;  %v143_v18 = vld [vmem:[#allocation4 + $0x10] sm:$0xff]  ;;  %v300_v23 = vld [vmem:[#allocation4 + $0x20] sm:$0xff] }
  0x38   :  { %489 = vmatpush3.msra.mxu1 %v145_v6  ;;  %v144_v19 = vld [vmem:[#allocation4 + $0x18] sm:$0xff]  ;;  %v301_v24 = vld [vmem:[#allocation4 + $0x28] sm:$0xff] }
  0x39   :  { %514 = vmatpush3.bf16.msra.mxu0 %v513_v4  ;;  %515 = vmatprep.subr.bf16.mxu1 %v610_v0  ;;  %v62_v9 = vsub.s32 0, %v61_v8  ;;  %v516_v20 = vpack.c.bf16 %v144_v19, %v143_v18  ;;  %v303_v22 = vld [vmem:[#allocation6 + $0x8] sm:$0xff]  ;;  %v519_v25 = vpack.c.bf16 %v301_v24, %v300_v23  ;;  %v292_v26 = vsub.s32 1, %v61_v8 }
  0x3a   :  { %500 = vmatprep.subr.mxu0 %v612_v1  ;;  %v449_v40 = vsub.s32 2, %v61_v8 }
  0x3b   :  { %v63_v11 = vrot.slane %v57_v10, %v62_v9  ;;  %v293_v29 = vrot.slane %v57_v10, %v292_v26 }
  0x3c   :  { %486 = vmatmul.mubr.msk.f32.vlgmr.msra.gmra.mrb[0].mxu0 %vm64_vm1, %v56_v5  ;;  %v450_v41 = vrot.slane %v57_v10, %v449_v40 }
  0x3d   :  { %502 = vmatprep.mubr.msk.f32.mxu0 %vm611_vm0, %v612_v1  ;;  %501 = vmatpush3.msra.mxu0 %v303_v22 }
 0x10f   :  { %v134_v12 = vpop.f32.mrb[0].mxu0 }
 0x110   :  { %v135_v13 = vadd.f32 %v134_v12, %v63_v11  ;;  %v487_v14 = vpop.f32.mrb[1].mxu0 }
 0x112   :  { %v138_v15 = vmul.f32 %v135_v13, %v135_v13 }
 0x114   :  { %v139_v16 = vsub.f32 0.0, %v138_v15 }
 0x116   :  { %v140_v17 = vmul.f32 1.442695, %v139_v16 }
 0x118   :  { %529 = vpow2.f32 %v140_v17 }
 0x122   :  { %v530_v21 = vpop.eup %529 }
 0x123   :  { %491 = vmatmul.mubr.msk.f32.vlgmr.msra.gmra.mrb[0].mxu1 %vm146_vm2, %v530_v21 }
 0x124   :  { %517 = vmatpush3.bf16.msra.mxu1 %v516_v20  ;;  %497 = vmatprep.mubr.msk.f32.mxu1 %vm611_vm0, %v612_v1 }
 0x125   :  { %518 = vmatprep.subr.bf16.mxu1 %v610_v0 }
 0x127   :  { %498 = vmatmul.mubr.msk.f32.vlgmr.msra.gmra.mrb[2].mxu1 %vm64_vm1, %v56_v5 }
 0x128   :  { %509 = vmatprep.mubr.msk.f32.mxu1 %vm611_vm0, %v612_v1  ;;  %520 = vmatpush3.bf16.msra.mxu1 %v519_v25 }
 0x12b   :  { %510 = vmatmul.mubr.msk.f32.vlgmr.msra.gmra.mrb[4].mxu1 %vm64_vm1, %v56_v5 }
 0x1f6   :  { %v216_v27 = vpop.f32.mrb[0].mxu1 }
 0x1f7   :  { %v492_v28 = vpop.f32.mrb[1].mxu1 }
 0x1fa   :  { %v286_v30 = vpop.f32.mrb[2].mxu1 }
 0x1fb   :  { %v287_v31 = vadd.f32 %v286_v30, %v216_v27  ;;  %v499_v32 = vpop.f32.mrb[3].mxu1 }
 0x1fd   :  { %v294_v33 = vadd.f32 %v293_v29, %v287_v31 }
 0x1fe   :  { %v443_v38 = vpop.f32.mrb[4].mxu1 }
 0x1ff   :  { %v295_v34 = vmul.f32 %v294_v33, %v294_v33  ;;  %v511_v39 = vpop.f32.mrb[5].mxu1 }
 0x201   :  { %v296_v35 = vsub.f32 0.0, %v295_v34 }
 0x203   :  { %v297_v36 = vmul.f32 1.442695, %v296_v35 }
 0x205   :  { %531 = vpow2.f32 %v297_v36 }
 0x20f   :  { %v532_v37 = vpop.eup %531 }
 0x210   :  { %503 = vmatmul.mubr.msk.f32.vlgmr.msra.gmra.mrb[2].mxu0 %vm146_vm2, %v532_v37 }
 0x2e3   :  { %v373_v42 = vpop.f32.mrb[2].mxu0 }
 0x2e4   :  { %v444_v43 = vadd.f32 %v443_v38, %v373_v42  ;;  %v504_v44 = vpop.f32.mrb[3].mxu0 }
 0x2e6   :  { %v451_v45 = vadd.f32 %v450_v41, %v444_v43 }
 0x2e8   :  { %v452_v46 = vmul.f32 %v451_v45, %v451_v45 }
 0x2ea   :  { %v453_v47 = vsub.f32 0.0, %v452_v46 }
 0x2ec   :  { %v454_v48 = vmul.f32 1.442695, %v453_v47 }
 0x2ee   :  { %533 = vpow2.f32 %v454_v48 }
 0x2f8   :  { %v534_v49 = vpop.eup %533 }
 0x2f9   :  { %456 = vst [vmem:[%s700_s4] sm:$0xff] %v534_v49 }
 0x2fa   :  { %461 = vsyncpa [#allocation3], 1 }
 0x2fb   :  { %462 = vsyncpa [#allocation5], 1 }

</bundles_post_ra>
